<compile_context>
chip_gen: v7x
topology: tpu7x:2x2x1
jax: 0.10.0
libtpu: 0.0.40
codegen_flags: <defaults>
</compile_context>

<pallas_src>
import math
from functools import partial

import numpy as np
import jax
import jax.numpy as jnp
from jax.experimental import pallas as pl
from jax.experimental.pallas import tpu as pltpu


# ----------------------------- DCT weight construction (host-side constant) ----

def get_1d_dct(i, freq, L):
    result = math.cos(math.pi * freq * (i + 0.5) / L) / math.sqrt(L)
    return result * (1.0 if freq == 0 else math.sqrt(2.0))


def get_dct_weights(width, channel, fidx_u, fidx_v):
    # same semantics as the PyTorch helper, but returns (channel, width, width)
    w = np.zeros((channel, width, width), dtype=np.float32)
    c_part = channel // len(fidx_u)
    for i, (u_x, v_y) in enumerate(zip(fidx_u, fidx_v)):
        for x in range(width):
            for y in range(width):
                coor = get_1d_dct(x, u_x, width) * get_1d_dct(y, v_y, width)
                w[i * c_part:(i + 1) * c_part, x, y] = coor
    return jnp.asarray(w)


# ----------------------------- Pallas kernel ------------------------------------

def fca_kernel(x_ref, dctw_ref, w1t_ref, b1_ref, w2t_ref, b2_ref, out_ref, acc_ref,
               *, dct_resident):
    """Fused DCT-weighted global pooling + (1x1 conv, LeakyReLU, 1x1 conv, Sigmoid).

    x_ref:    (B_blk, C, TN)  current batch-block / spatial tile (spatial on lanes)
    dctw_ref: (C, Npad)       resident DCT weights  (or (C, TN) tile if streamed)
    w1t_ref:  (C, C_mid)      first 1x1 conv weight, transposed to (in, out)
    b1_ref:   (1, C_mid)
    w2t_ref:  (C_mid, C_out)  second 1x1 conv weight, transposed to (in, out)
    b2_ref:   (1, C_out)
    out_ref:  (B_blk, 1, C_out)   lane-dense output block
    acc_ref:  (B_blk, C, 128) f32 lane-dense running accumulator
    """
    t = pl.program_id(1)
    b_blk, c, tn = x_ref.shape

    @pl.when(t == 0)
    def _init():
        acc_ref[...] = jnp.zeros_like(acc_ref)

    if dct_resident:
        start = pl.multiple_of(t * tn, 128)
        dct_tile = dctw_ref[:, pl.ds(start, tn)]          # slice the resident block
    else:
        dct_tile = dctw_ref[...]                          # streamed per-tile block

    # Weighted pooling for this tile: VPU multiply, f32 accumulate.
    prod = x_ref[...].astype(jnp.float32) * dct_tile[None, :, :].astype(jnp.float32)

    # Lane-dense accumulation: 128-lane-aligned slices -> pure VPU adds,
    # no per-tile cross-lane reduce, no masked narrow stores.
    acc = acc_ref[...]
    for j in range(tn // 128):
        acc = acc + prod[:, :, j * 128:(j + 1) * 128]
    acc_ref[...] = acc

    @pl.when(t == pl.num_programs(1) - 1)
    def _finalize():
        pooled = jnp.sum(acc_ref[...], axis=-1)                               # (B_blk, C)
        h = jnp.dot(pooled, w1t_ref[...],
                    preferred_element_type=jnp.float32) + b1_ref[...]         # (B_blk, C_mid)
        h = jnp.where(h >= 0.0, h, 0.1 * h)                                   # LeakyReLU(0.1)
        o = jnp.dot(h, w2t_ref[...],
                    preferred_element_type=jnp.float32) + b2_ref[...]         # (B_blk, C_out)
        o = 1.0 / (1.0 + jnp.exp(-o))                                         # Sigmoid
        out_ref[...] = o[:, None, :].astype(out_ref.dtype)


# ----------------------------- VMEM budgeting / tiling ---------------------------

def _vmem_limit_bytes():
    """Generation-aware scoped-VMEM limit (~5/8 of physical VMEM)."""
    cap = 64 * 1024 * 1024                                  # conservative (v7x)
    try:
        info = pltpu.get_tpu_info()
        cap = int(getattr(info, "vmem_capacity_bytes", cap))
    except Exception:
        pass
    # v7x (64 MiB) -> 40 MiB limit; v5e/v6e (128 MiB) -> 80 MiB limit.
    return max(32 * 1024 * 1024, min(cap * 5 // 8, 96 * 1024 * 1024))


def _choose_config(B, C, Npad, itemsize, vmem_limit):
    """Pick (batch fold, spatial tile, dct residency) under the VMEM budget."""
    MARGIN = 4 * 1024 * 1024          # internal scratch / output blocks / slack
    CONSTS = 512 * 1024               # tiny MLP weights (double-buffered worst case)
    TN_CAP = 8192                     # keeps the per-tile unrolled add count small
    dct_full = 2 * C * Npad * itemsize            # resident dct (assume 2 buffers)

    def footprint(b_blk, tn, resident):
        x_blk = 2 * b_blk * C * tn * itemsize     # double-buffered x tiles
        prod = b_blk * C * tn * 4                 # possibly-materialized product temp
        acc = b_blk * C * 128 * 4                 # accumulator scratch
        dct = dct_full if resident else 2 * C * tn * itemsize
        return x_blk + prod + acc + dct + CONSTS + MARGIN

    dct_resident = footprint(1, 128, True) <= vmem_limit

    # Largest divisor of B whose folded block still fits at the minimum tile.
    b_blk = 1
    for d in range(B, 0, -1):
        if B % d == 0 and footprint(d, 128, dct_resident) <= vmem_limit:
            b_blk = d
            break

    # Largest multiple-of-128 divisor of Npad under budget.
    tn = 128
    q = Npad // 128
    for k in range(1, q + 1):
        if q % k == 0:
            cand = 128 * k
            if cand <= TN_CAP and footprint(b_blk, cand, dct_resident) <= vmem_limit:
                tn = cand
    return b_blk, tn, dct_resident


# ----------------------------- forward wrapper -----------------------------------

def fcanet_forward(x, dct_weights, w1, b1, w2, b2):
    """x: (B, C, H, W) NCHW. Returns (B, chan_out, 1, 1), matching the PyTorch module."""
    B, C, H, W = x.shape
    N = H * W
    C_mid, C_out = w1.shape[0], w2.shape[0]

    x_flat = x.reshape(B, C, N)                   # free reshape, spatial on the lane axis
    dct_flat = dct_weights.reshape(C, N).astype(x.dtype)

    # Pad the spatial (lane) axis to a multiple of 128.  The dct padding is
    # zero, so padded positions contribute nothing to the pooled sum.
    Npad = ((N + 127) // 128) * 128
    if Npad != N:
        x_flat = jnp.pad(x_flat, ((0, 0), (0, 0), (0, Npad - N)))
        dct_flat = jnp.pad(dct_flat, ((0, 0), (0, Npad - N)))

    itemsize = jnp.dtype(x_flat.dtype).itemsize
    vmem_limit = _vmem_limit_bytes()
    b_blk, tn, dct_resident = _choose_config(B, C, Npad, itemsize, vmem_limit)
    nt = Npad // tn

    # Tiny weights: transpose to (in, out) so the finalize is (B,C)@(C,Cmid);
    # biases as lane-dense (1, Cmid)/(1, Cout) rows.
    w1t = jnp.transpose(w1).astype(jnp.float32)
    w2t = jnp.transpose(w2).astype(jnp.float32)
    b1r = b1.reshape(1, C_mid).astype(jnp.float32)
    b2r = b2.reshape(1, C_out).astype(jnp.float32)

    if dct_resident:
        # Constant block index -> DMA'd from HBM exactly once, stays in VMEM.
        dct_spec = pl.BlockSpec((C, Npad), lambda bb, t: (0, 0))
    else:
        # Fallback for pathological C*N: stream matching tiles.
        dct_spec = pl.BlockSpec((C, tn), lambda bb, t: (0, t))

    # Triple-buffer small x tiles so DMA latency at tile boundaries stays hidden.
    if nt >= 3 and b_blk * C * tn * itemsize < 512 * 1024:
        x_spec = pl.BlockSpec((b_blk, C, tn), lambda bb, t: (bb, 0, t),
                              pipeline_mode=pl.Buffered(3))
    else:
        x_spec = pl.BlockSpec((b_blk, C, tn), lambda bb, t: (bb, 0, t))

    out = pl.pallas_call(
        partial(fca_kernel, dct_resident=dct_resident),
        out_shape=jax.ShapeDtypeStruct((B, 1, C_out), x.dtype),
        grid=(B // b_blk, nt),
        in_specs=[
            x_spec,                                                # x tiles
            dct_spec,                                              # dct (resident)
            pl.BlockSpec((C, C_mid), lambda bb, t: (0, 0)),        # W1^T
            pl.BlockSpec((1, C_mid), lambda bb, t: (0, 0)),        # b1
            pl.BlockSpec((C_mid, C_out), lambda bb, t: (0, 0)),    # W2^T
            pl.BlockSpec((1, C_out), lambda bb, t: (0, 0)),        # b2
        ],
        out_specs=pl.BlockSpec((b_blk, 1, C_out), lambda bb, t: (bb, 0, 0)),
        scratch_shapes=[pltpu.VMEM((b_blk, C, 128), jnp.float32)],
        compiler_params=pltpu.CompilerParams(
            dimension_semantics=("parallel", "arbitrary"),
            vmem_limit_bytes=vmem_limit,
        ),
    )(x_flat, dct_flat, w1t, b1r, w2t, b2r)

    return out.reshape(B, C_out, 1, 1)


# ----------------------------- pure-JAX reference --------------------------------

def fcanet_ref(x, dct_weights, w1, b1, w2, b2):
    pooled = jnp.sum(x.astype(jnp.float32) * dct_weights[None].astype(jnp.float32),
                     axis=(2, 3))                                   # (B, C)
    h = pooled @ w1.T.astype(jnp.float32) + b1.astype(jnp.float32)
    h = jnp.where(h >= 0.0, h, 0.1 * h)
    o = h @ w2.T.astype(jnp.float32) + b2.astype(jnp.float32)
    o = 1.0 / (1.0 + jnp.exp(-o))
    return o.reshape(x.shape[0], w2.shape[0], 1, 1).astype(x.dtype)


# ----------------------------- main ----------------------------------------------

if __name__ == "__main__":
    B, chan_in, chan_out, width, reduction = 2, 32, 32, 16, 4

    key = jax.random.PRNGKey(0)
    kx, k1, k2, k3, k4 = jax.random.split(key, 5)

    x = jax.random.normal(kx, (B, chan_in, width, width), jnp.float32)

    freq_w, freq_h = [0] * 8, list(range(8))
    dct_w = get_dct_weights(width, chan_in, [*freq_w, *freq_h], [*freq_h, *freq_w])

    chan_inter = max(3, chan_out // reduction)
    w1 = jax.random.normal(k1, (chan_inter, chan_in), jnp.float32) * 0.1
    b1 = jax.random.normal(k2, (chan_inter,), jnp.float32) * 0.1
    w2 = jax.random.normal(k3, (chan_out, chan_inter), jnp.float32) * 0.1
    b2 = jax.random.normal(k4, (chan_out,), jnp.float32) * 0.1

    out = fcanet_forward(x, dct_w, w1, b1, w2, b2)
    out = jax.block_until_ready(out)
    assert out.shape == (B, chan_out, 1, 1), out.shape

    ref = fcanet_ref(x, dct_w, w1, b1, w2, b2)
    err = float(jnp.max(jnp.abs(out - ref)))
    assert bool(jnp.allclose(out, ref, rtol=1e-4, atol=1e-5)), f"max abs err {err}"

    print("KERNEL_OK")
</pallas_src>

<mosaic_0001>
module attributes {stable_mosaic.version = 11 : i64} {
  func.func @fca_kernel(%arg0: i32, %arg1: i32, %arg2: memref<2x32x256xf32, #tpu.memory_space<vmem>>, %arg3: memref<32x256xf32, #tpu.memory_space<vmem>>, %arg4: memref<32x8xf32, #tpu.memory_space<vmem>>, %arg5: memref<1x8xf32, #tpu.memory_space<vmem>>, %arg6: memref<8x32xf32, #tpu.memory_space<vmem>>, %arg7: memref<1x32xf32, #tpu.memory_space<vmem>>, %arg8: memref<2x1x32xf32, #tpu.memory_space<vmem>>, %arg9: memref<2x32x128xf32, #tpu.memory_space<vmem>>) attributes {dimension_semantics = [#tpu.dimension_semantics<parallel>, #tpu.dimension_semantics<arbitrary>], iteration_bounds = array<i64: 1, 1>, scalar_prefetch = 0 : i64, scratch_operands = 1 : i64, tpu.core_type = #tpu.core_type<tc>, window_params = [{transform_indices = @transform_0, window_bounds = array<i64: 2, 32, 256>}, {pipeline_mode = #tpu.pipeline_mode<synchronous>, transform_indices = @transform_1, window_bounds = array<i64: 32, 256>}, {pipeline_mode = #tpu.pipeline_mode<synchronous>, transform_indices = @transform_2, window_bounds = array<i64: 32, 8>}, {pipeline_mode = #tpu.pipeline_mode<synchronous>, transform_indices = @transform_3, window_bounds = array<i64: 1, 8>}, {pipeline_mode = #tpu.pipeline_mode<synchronous>, transform_indices = @transform_4, window_bounds = array<i64: 8, 32>}, {pipeline_mode = #tpu.pipeline_mode<synchronous>, transform_indices = @transform_5, window_bounds = array<i64: 1, 32>}, {transform_indices = @transform_6, window_bounds = array<i64: 2, 1, 32>}]} {
    %c0_i32 = arith.constant 0 : i32
    %0 = arith.cmpi eq, %arg1, %c0_i32 : i32
    %1 = arith.extui %0 : i1 to i32
    %c0_i32_0 = arith.constant 0 : i32
    %2 = arith.cmpi ne, %1, %c0_i32_0 : i32
    scf.if %2 {
      %cst = arith.constant 0.000000e+00 : f32
      %20 = vector.broadcast %cst : f32 to vector<2x32x128xf32>
      %c0_12 = arith.constant 0 : index
      %c0_13 = arith.constant 0 : index
      %c0_14 = arith.constant 0 : index
      %21 = vector.load %arg9[%c0_12, %c0_13, %c0_14] : memref<2x32x128xf32, #tpu.memory_space<vmem>>, vector<2x32x128xf32>
      tpu.vector_store %arg9[%c0_12, %c0_13, %c0_14], %20 {strides = array<i32>} : memref<2x32x128xf32, #tpu.memory_space<vmem>>, vector<2x32x128xf32>,
    } else {
    }
    %c256_i32 = arith.constant 256 : i32
    %3 = arith.muli %arg1, %c256_i32 : i32
    %4 = tpu.assume_multiple %3, 128 : i32
    %c0 = arith.constant 0 : index
    %5 = arith.index_cast %4 : i32 to index
    %6 = vector.load %arg3[%c0, %5] : memref<32x256xf32, #tpu.memory_space<vmem>>, vector<32x256xf32>
    %c0_1 = arith.constant 0 : index
    %c0_2 = arith.constant 0 : index
    %c0_3 = arith.constant 0 : index
    %7 = vector.load %arg2[%c0_1, %c0_2, %c0_3] : memref<2x32x256xf32, #tpu.memory_space<vmem>>, vector<2x32x256xf32>
    %8 = vector.shape_cast %6 : vector<32x256xf32> to vector<1x32x256xf32>
    %9 = vector.broadcast %8 : vector<1x32x256xf32> to vector<2x32x256xf32>
    %10 = arith.mulf %7, %9 : vector<2x32x256xf32>
    %c0_4 = arith.constant 0 : index
    %c0_5 = arith.constant 0 : index
    %c0_6 = arith.constant 0 : index
    %11 = vector.load %arg9[%c0_4, %c0_5, %c0_6] : memref<2x32x128xf32, #tpu.memory_space<vmem>>, vector<2x32x128xf32>
    %12 = vector.extract_strided_slice %10 {offsets = [0, 0, 0], sizes = [2, 32, 128], strides = [1, 1, 1]} : vector<2x32x256xf32> to vector<2x32x128xf32>
    %13 = arith.addf %11, %12 : vector<2x32x128xf32>
    %14 = vector.extract_strided_slice %10 {offsets = [0, 0, 128], sizes = [2, 32, 128], strides = [1, 1, 1]} : vector<2x32x256xf32> to vector<2x32x128xf32>
    %15 = arith.addf %13, %14 : vector<2x32x128xf32>
    %c0_7 = arith.constant 0 : index
    %c0_8 = arith.constant 0 : index
    %c0_9 = arith.constant 0 : index
    %16 = vector.load %arg9[%c0_7, %c0_8, %c0_9] : memref<2x32x128xf32, #tpu.memory_space<vmem>>, vector<2x32x128xf32>
    tpu.vector_store %arg9[%c0_7, %c0_8, %c0_9], %15 {strides = array<i32>} : memref<2x32x128xf32, #tpu.memory_space<vmem>>, vector<2x32x128xf32>,
    %c0_i32_10 = arith.constant 0 : i32
    %17 = arith.cmpi eq, %arg1, %c0_i32_10 : i32
    %18 = arith.extui %17 : i1 to i32
    %c0_i32_11 = arith.constant 0 : i32
    %19 = arith.cmpi ne, %18, %c0_i32_11 : i32
    scf.if %19 {
      %c0_12 = arith.constant 0 : index
      %c0_13 = arith.constant 0 : index
      %c0_14 = arith.constant 0 : index
      %20 = vector.load %arg9[%c0_12, %c0_13, %c0_14] : memref<2x32x128xf32, #tpu.memory_space<vmem>>, vector<2x32x128xf32>
      %cst = arith.constant dense<0.000000e+00> : vector<2x32xf32>
      %21 = vector.multi_reduction <add>, %20, %cst [2] : vector<2x32x128xf32> to vector<2x32xf32>
      %c0_15 = arith.constant 0 : index
      %c0_16 = arith.constant 0 : index
      %22 = vector.load %arg4[%c0_15, %c0_16] : memref<32x8xf32, #tpu.memory_space<vmem>>, vector<32x8xf32>
      %cst_17 = arith.constant dense<0.000000e+00> : vector<2x8xf32>
      %23 = tpu.matmul %21, %22, %cst_17 {dimension_numbers = #tpu.dot_dimension_numbers<[1], [0], [0], [1], [0, 0, 1, 1], [], []>} : vector<2x32xf32>, vector<32x8xf32>, vector<2x8xf32> -> vector<2x8xf32>
      %c0_18 = arith.constant 0 : index
      %c0_19 = arith.constant 0 : index
      %24 = vector.load %arg5[%c0_18, %c0_19] : memref<1x8xf32, #tpu.memory_space<vmem>>, vector<1x8xf32>
      %25 = vector.broadcast %24 : vector<1x8xf32> to vector<2x8xf32>
      %26 = arith.addf %23, %25 : vector<2x8xf32>
      %cst_20 = arith.constant 0.000000e+00 : f32
      %27 = vector.broadcast %cst_20 : f32 to vector<2x8xf32>
      %28 = arith.cmpf oge, %26, %27 : vector<2x8xf32>
      %cst_21 = arith.constant 1.000000e-01 : f32
      %29 = vector.broadcast %cst_21 : f32 to vector<2x8xf32>
      %30 = arith.mulf %29, %26 : vector<2x8xf32>
      %31 = arith.select %28, %26, %30 : vector<2x8xi1>, vector<2x8xf32>
      %c0_22 = arith.constant 0 : index
      %c0_23 = arith.constant 0 : index
      %32 = vector.load %arg6[%c0_22, %c0_23] : memref<8x32xf32, #tpu.memory_space<vmem>>, vector<8x32xf32>
      %cst_24 = arith.constant dense<0.000000e+00> : vector<2x32xf32>
      %33 = tpu.matmul %31, %32, %cst_24 {dimension_numbers = #tpu.dot_dimension_numbers<[1], [0], [0], [1], [0, 0, 1, 1], [], []>} : vector<2x8xf32>, vector<8x32xf32>, vector<2x32xf32> -> vector<2x32xf32>
      %c0_25 = arith.constant 0 : index
      %c0_26 = arith.constant 0 : index
      %34 = vector.load %arg7[%c0_25, %c0_26] : memref<1x32xf32, #tpu.memory_space<vmem>>, vector<1x32xf32>
      %35 = vector.broadcast %34 : vector<1x32xf32> to vector<2x32xf32>
      %36 = arith.addf %33, %35 : vector<2x32xf32>
      %cst_27 = arith.constant 0.000000e+00 : f32
      %37 = vector.broadcast %cst_27 : f32 to vector<2x32xf32>
      %38 = arith.subf %37, %36 : vector<2x32xf32>
      %39 = math.exp %38 : vector<2x32xf32>
      %cst_28 = arith.constant 1.000000e+00 : f32
      %40 = vector.broadcast %cst_28 : f32 to vector<2x32xf32>
      %41 = arith.addf %40, %39 : vector<2x32xf32>
      %cst_29 = arith.constant 1.000000e+00 : f32
      %42 = vector.broadcast %cst_29 : f32 to vector<2x32xf32>
      %43 = arith.divf %42, %41 : vector<2x32xf32>
      %44 = vector.shape_cast %43 : vector<2x32xf32> to vector<2x1x32xf32>
      %c0_30 = arith.constant 0 : index
      %c0_31 = arith.constant 0 : index
      %c0_32 = arith.constant 0 : index
      %45 = vector.load %arg8[%c0_30, %c0_31, %c0_32] : memref<2x1x32xf32, #tpu.memory_space<vmem>>, vector<2x1x32xf32>
      tpu.vector_store %arg8[%c0_30, %c0_31, %c0_32], %44 {strides = array<i32>} : memref<2x1x32xf32, #tpu.memory_space<vmem>>, vector<2x1x32xf32>,
    } else {
    }
    return
  }
  func.func @transform_0(%arg0: i32, %arg1: i32) -> (i32, i32, i32) {
    %c0_i32 = arith.constant 0 : i32
    %c0_i32_0 = arith.constant 0 : i32
    return %arg0, %c0_i32, %arg1 : i32, i32, i32
  }
  func.func @transform_1(%arg0: i32, %arg1: i32) -> (i32, i32) {
    %c0_i32 = arith.constant 0 : i32
    %c0_i32_0 = arith.constant 0 : i32
    %c0_i32_1 = arith.constant 0 : i32
    return %c0_i32, %c0_i32_0 : i32, i32
  }
  func.func @transform_2(%arg0: i32, %arg1: i32) -> (i32, i32) {
    %c0_i32 = arith.constant 0 : i32
    %c0_i32_0 = arith.constant 0 : i32
    %c0_i32_1 = arith.constant 0 : i32
    return %c0_i32, %c0_i32_0 : i32, i32
  }
  func.func @transform_3(%arg0: i32, %arg1: i32) -> (i32, i32) {
    %c0_i32 = arith.constant 0 : i32
    %c0_i32_0 = arith.constant 0 : i32
    %c0_i32_1 = arith.constant 0 : i32
    return %c0_i32, %c0_i32_0 : i32, i32
  }
  func.func @transform_4(%arg0: i32, %arg1: i32) -> (i32, i32) {
    %c0_i32 = arith.constant 0 : i32
    %c0_i32_0 = arith.constant 0 : i32
    %c0_i32_1 = arith.constant 0 : i32
    return %c0_i32, %c0_i32_0 : i32, i32
  }
  func.func @transform_5(%arg0: i32, %arg1: i32) -> (i32, i32) {
    %c0_i32 = arith.constant 0 : i32
    %c0_i32_0 = arith.constant 0 : i32
    %c0_i32_1 = arith.constant 0 : i32
    return %c0_i32, %c0_i32_0 : i32, i32
  }
  func.func @transform_6(%arg0: i32, %arg1: i32) -> (i32, i32, i32) {
    %c0_i32 = arith.constant 0 : i32
    %c0_i32_0 = arith.constant 0 : i32
    %c0_i32_1 = arith.constant 0 : i32
    return %arg0, %c0_i32, %c0_i32_0 : i32, i32, i32
  }
}

</mosaic_0001>

<bundles_post_ra>
// kernel: tpu_custom_call.1
= control target key start
LH: loop header
LB: loop body
LE: loop exit
PB: predicated region body
PF: predicated region fallthrough
CT: control target
= control target key end

     0   :  { %11 = vsyncpa [#allocation4], 0  ;;  %s672_s0 = inlined_call_operand.hbm [shape: f32[2,32,256], index: 0, kind: input, shape index: {}]   ;;  %s673_s1 = inlined_call_operand.hbm [shape: f32[32,256], index: 1, kind: input, shape index: {}]   ;;  %s674_s2 = inlined_call_operand.vmem [shape: f32[32,8], index: 2, kind: input, shape index: {}]   ;;  %s675_s3 = inlined_call_operand.vmem [shape: f32[1,8], index: 3, kind: input, shape index: {}]   ;;  %s676_s4 = inlined_call_operand.vmem [shape: f32[8,32], index: 4, kind: input, shape index: {}]   ;;  %s677_s5 = inlined_call_operand.vmem [shape: f32[1,32], index: 5, kind: input, shape index: {}]   ;;  %s678_s6 = inlined_call_operand.hbm [shape: f32[2,1,32], index: 6, kind: output, shape index: {}]  }
   0x1   :  { %12 = vsyncpa [#allocation7], 0 }
   0x2   :  { %13 = vsyncpa [#allocation5], 0  ;;  %s566_s21 = smov [#allocation3]   ;;  %s494_s25 = scalar_lea.hbm %s672_s0, 2048 }
   0x3   :  { %s19_s22 = sshll.u32 %s566_s21, 4  ;;  %p495_p0 = scmp.ne.s32.totalorder %s672_s0, %s494_s25  ;;  %s20_s22 = int_to_ptr.vmem [resolvable:$true] %s19_s22 }
   0x4   :  { %p498_p1 = scmp.lt.u32.totalorder %s494_s25, %s672_s0 }
   0x6   :  { %p500_p2 = pnand %p498_p1, %p495_p0 }
   0x8   :  { %503 = shalt.err (!%p500_p2)
}
   0x9   :  { %s504_s30 = scalar_lea.vmem %s20_s22, 2048  ;;  %p509_p4 = scmp.lt.s32.totalorder %s20_s22, %s20_s22 }
   0xa   :  { %p505_p3 = scmp.ne.s32.totalorder %s20_s22, %s504_s30  ;;  %p510_p5 = scmp.lt.s32.totalorder %s504_s30, %s504_s30 }
   0xc   :  { %p511_p6 = por %p510_p5, %p509_p4 }
   0xe   :  { %p512_p7 = pnand %p511_p6, %p505_p3 }
  0x10   :  { %515 = shalt.err (!%p512_p7)
}
  0x11   :  { %s567_s7 = smov 256   ;;  %s568_s8 = smov 16  }
  0x12   :  { %25 = dma.hbm_to_vmem [thread:$0]  %s672_s0, 2048, %s20_s22, [#allocation4], %s567_s7, %s567_s7, %s568_s8  }
  0x13   :  { %s569_s11 = smov [#allocation6]   ;;  %s516_s15 = scalar_lea.hbm %s673_s1, 1024 }
  0x14   :  { %s31_s12 = sshll.u32 %s569_s11, 4  ;;  %p517_p8 = scmp.ne.s32.totalorder %s673_s1, %s516_s15  ;;  %s32_s12 = int_to_ptr.vmem [resolvable:$true] %s31_s12 }
  0x15   :  { %p520_p9 = scmp.lt.u32.totalorder %s516_s15, %s673_s1 }
  0x17   :  { %p522_p10 = pnand %p520_p9, %p517_p8 }
  0x19   :  { %525 = shalt.err (!%p522_p10)
}
  0x1a   :  { %s526_s20 = scalar_lea.vmem %s32_s12, 1024  ;;  %p531_p12 = scmp.lt.s32.totalorder %s32_s12, %s32_s12 }
  0x1b   :  { %p527_p11 = scmp.ne.s32.totalorder %s32_s12, %s526_s20  ;;  %p532_p13 = scmp.lt.s32.totalorder %s526_s20, %s526_s20 }
  0x1d   :  { %p533_p0 = por %p532_p13, %p531_p12 }
  0x1f   :  { %p534_p1 = pnand %p533_p0, %p527_p11 }
  0x21   :  { %537 = shalt.err (!%p534_p1)
}
  0x22   :  { %37 = dma.hbm_to_vmem [thread:$0]  %s673_s1, 1024, %s32_s12, [#allocation7], %s567_s7, %s567_s7, %s568_s8  }
  0x23   :  { %560 = dma.done.wait [#allocation4], 2048  }
  0x24   :  { %561 = vsyncadd [#allocation4], 4294965248 }
  0x25   :  { %562 = dma.done.wait [#allocation7], 1024  }
  0x26   :  { %563 = vsyncadd [#allocation7], 4294966272  ;;  %v69_v0 = vld [vmem:[#allocation6] sm:$0xff]  ;;  %v70_v1 = vld [vmem:[#allocation6 + $0x8] sm:$0xff]  ;;  %v570_v51 = vmov 0.0|0.0   ;;  %vm571_vm0 = vmmov 0   ;;  %v187_v56 = vlaneseq }
  0x27   :  { %v85_v2 = vld [vmem:[#allocation3 + $0x40] sm:$0xff]  ;;  %v86_v3 = vld [vmem:[#allocation3 + $0x48] sm:$0xff]  ;;  %v71_v10 = vld [vmem:[#allocation6 + $0x10] sm:$0xff]  ;;  %474 = vmatprep.subr.bf16.mxu0 %v570_v51  ;;  %v572_v55 = vmov 0.0   ;;  %vm198_vm1 = vcmask 130112   ;;  %vm205_vm2 = vcmask 195712  }
  0x28   :  { %v101_v4 = vmul.f32 %v85_v2, %v69_v0  ;;  %v77_v5 = vld [vmem:[#allocation3] sm:$0xff]  ;;  %v78_v6 = vld [vmem:[#allocation3 + $0x8] sm:$0xff]  ;;  %v102_v7 = vmul.f32 %v86_v3, %v70_v1  ;;  %v72_v11 = vld [vmem:[#allocation6 + $0x18] sm:$0xff]  ;;  %466 = vmatprep.mubr.msk.f32.mxu0 %vm571_vm0, %v572_v55  ;;  %469 = vmatprep.subr.mxu1 %v572_v55  ;;  %v188_v57 = vand.u32 127, %v187_v56  ;;  %v190_v62 = vshrl.u32 %v187_v56, 7 }
  0x29   :  { %v93_v8 = vmul.f32 %v77_v5, %v69_v0  ;;  %v94_v9 = vmul.f32 %v78_v6, %v70_v1  ;;  %v87_v12 = vld [vmem:[#allocation3 + $0x50] sm:$0xff]  ;;  %v88_v13 = vld [vmem:[#allocation3 + $0x58] sm:$0xff]  ;;  %v73_v21 = vld [vmem:[#allocation6 + $0x20] sm:$0xff]  ;;  %471 = vmatprep.mubr.msk.f32.mxu1 %vm571_vm0, %v572_v55  ;;  %vm212_vm3 = vcmask 261312   ;;  %vm233_vm4 = vcmask 1041409  }
  0x2a   :  { %v103_v14 = vmul.f32 %v87_v12, %v71_v10  ;;  %v79_v15 = vld [vmem:[#allocation3 + $0x10] sm:$0xff]  ;;  %v80_v16 = vld [vmem:[#allocation3 + $0x18] sm:$0xff]  ;;  %v129_v17 = vadd.f32 %v102_v7, %v101_v4  ;;  %v104_v19 = vmul.f32 %v88_v13, %v72_v11  ;;  %v74_v22 = vld [vmem:[#allocation6 + $0x28] sm:$0xff]  ;;  %v193_v60 = vadd.s32 4294967288, %v188_v57 }
  0x2b   :  { %v125_v18 = vadd.f32 %v94_v9, %v93_v8  ;;  %v95_v20 = vmul.f32 %v79_v15, %v71_v10  ;;  %v89_v23 = vld [vmem:[#allocation3 + $0x60] sm:$0xff]  ;;  %v96_v24 = vmul.f32 %v80_v16, %v72_v11  ;;  %v90_v25 = vld [vmem:[#allocation3 + $0x68] sm:$0xff]  ;;  %v75_v32 = vld [vmem:[#allocation6 + $0x30] sm:$0xff]  ;;  %v200_v61 = vadd.s32 4294967280, %v188_v57 }
  0x2c   :  { %v105_v26 = vmul.f32 %v89_v23, %v73_v21  ;;  %v81_v27 = vld [vmem:[#allocation3 + $0x20] sm:$0xff]  ;;  %v82_v28 = vld [vmem:[#allocation3 + $0x28] sm:$0xff]  ;;  %160 = vadd.xlane.f32.xlu1 %v129_v17  ;;  %v130_v29 = vadd.f32 %v104_v19, %v103_v14  ;;  %v106_v30 = vmul.f32 %v90_v25, %v74_v22  ;;  %v76_v33 = vld [vmem:[#allocation6 + $0x38] sm:$0xff]  ;;  %v196_v1 = vsub.s32 %v193_v60, %v190_v62 }
  0x2d   :  { %152 = vadd.xlane.f32.xlu0 %v125_v18  ;;  %v97_v31 = vmul.f32 %v81_v27, %v73_v21  ;;  %v91_v34 = vld [vmem:[#allocation3 + $0x70] sm:$0xff]  ;;  %v126_v35 = vadd.f32 %v96_v24, %v95_v20  ;;  %v98_v36 = vmul.f32 %v82_v28, %v74_v22  ;;  %v92_v37 = vld [vmem:[#allocation3 + $0x78] sm:$0xff]  ;;  %v168_v48 = vld [vmem:[%s674_s2] sm:$0xff]  ;;  %v207_v2 = vadd.s32 4294967272, %v188_v57 }
  0x2e   :  { %v83_v38 = vld [vmem:[#allocation3 + $0x30] sm:$0xff]  ;;  %v84_v39 = vld [vmem:[#allocation3 + $0x38] sm:$0xff]  ;;  %v131_v40 = vadd.f32 %v106_v30, %v105_v26  ;;  %v107_v41 = vmul.f32 %v91_v34, %v75_v32  ;;  %v108_v42 = vmul.f32 %v92_v37, %v76_v33  ;;  %v169_v49 = vld [vmem:[%s674_s2 + $0x8] sm:$0xff]  ;;  %v203_v3 = vsub.s32 %v200_v61, %v190_v62 }
  0x2f   :  { %v127_v43 = vadd.f32 %v98_v36, %v97_v31  ;;  %v99_v44 = vmul.f32 %v83_v38, %v75_v32  ;;  %v100_v45 = vmul.f32 %v84_v39, %v76_v33  ;;  %v475_v50 = vpack.c.bf16 %v169_v49, %v168_v48  ;;  %v170_v52 = vld [vmem:[%s674_s2 + $0x10] sm:$0xff]  ;;  %v171_v53 = vld [vmem:[%s674_s2 + $0x18] sm:$0xff]  ;;  %v311_v25 = vld [vmem:[%s676_s4] sm:$0xff] }
  0x30   :  { %162 = vadd.xlane.f32.xlu1 %v130_v29  ;;  %v132_v46 = vadd.f32 %v108_v42, %v107_v41  ;;  %v478_v54 = vpack.c.bf16 %v171_v53, %v170_v52  ;;  %v191_v4 = vsub.s32 %v188_v57, %v190_v62  ;;  %v210_v9 = vsub.s32 %v207_v2, %v190_v62  ;;  %v447_v26 = vld [vmem:[%s675_s3] ss:$0 sm:$0xff]  ;;  %s574_s3 = smov [#allocation8]  }
  0x31   :  { %154 = vadd.xlane.f32.xlu0 %v126_v35  ;;  %v128_v47 = vadd.f32 %v100_v45, %v99_v44  ;;  %476 = vmatpush3.bf16.msra.mxu0 %v475_v50  ;;  %vm235_vm5 = vcmask 261120   ;;  %vm319_vm7 = vcmask 64512   ;;  %v449_v32 = vld [vmem:[%s677_s5] ss:$0 sm:$0xff]  ;;  %vm424_vm8 = vcmask 253952   ;;  %s432_s4 = sshll.u32 %s574_s3, 4  ;;  %s433_s4 = int_to_ptr.vmem [resolvable:$true] %s432_s4 }
  0x32   :  { %477 = vmatprep.subr.bf16.mxu0 %v570_v51  ;;  %470 = vmatpush3.msra.mxu1 %v311_v25  ;;  %s538_s5 = scalar_lea.vmem %s433_s4, 32  ;;  %p543_p3 = scmp.lt.s32.totalorder %s433_s4, %s433_s4 }
  0x33   :  { %p539_p2 = scmp.ne.s32.totalorder %s433_s4, %s538_s5  ;;  %p544_p4 = scmp.lt.s32.totalorder %s538_s5, %s538_s5 }
  0x34   :  { %164 = vadd.xlane.f32.xlu1 %v131_v40  ;;  %v573_v40 = vmov 1966171168  }
  0x35   :  { %156 = vadd.xlane.f32.xlu0 %v127_v43  ;;  %479 = vmatpush3.bf16.msra.mxu0 %v478_v54  ;;  %v401_v41 = vunpack.c.l.s4 %v573_v40  ;;  %p545_p5 = por %p544_p4, %p543_p3 }
  0x37   :  { %v402_v42 = vunpack.c.0.s8 %v401_v41  ;;  %p546_p6 = pnand %p545_p5, %p539_p2 }
  0x38   :  { %166 = vadd.xlane.f32.xlu1 %v132_v46 }
  0x39   :  { %158 = vadd.xlane.f32.xlu0 %v128_v47  ;;  %v405_v43 = vsub.s32 %v402_v42, %v190_v62 }
  0xb9   :  { %v161_v58 = vpop.xlane.xlu1 %160 }
  0xba   :  { %v153_v59 = vpop.xlane.xlu0 %152  ;;  %v217_v12 = vrot.slane %v161_v58, %v191_v4 }
  0xbb   :  { %v192_v13 = vrot.slane %v153_v59, %v191_v4 }
  0xbd   :  { %v163_v63 = vpop.xlane.xlu1 %162 }
  0xbe   :  { %v155_v0 = vpop.xlane.xlu0 %154  ;;  %v221_v7 = vrot.slane %v163_v63, %v196_v1 }
  0xbf   :  { %v197_v8 = vrot.slane %v155_v0, %v196_v1 }
  0xc0   :  { %v222_v16 = vsel %vm198_vm1, %v221_v7, %v217_v12 }
  0xc1   :  { %v165_v5 = vpop.xlane.xlu1 %164  ;;  %v199_v17 = vsel %vm198_vm1, %v197_v8, %v192_v13 }
  0xc2   :  { %v157_v6 = vpop.xlane.xlu0 %156  ;;  %v226_v10 = vrot.slane %v165_v5, %v203_v3 }
  0xc3   :  { %v204_v11 = vrot.slane %v157_v6, %v203_v3 }
  0xc4   :  { %v227_v20 = vsel %vm205_vm2, %v226_v10, %v222_v16 }
  0xc5   :  { %v167_v14 = vpop.xlane.xlu1 %166  ;;  %v206_v21 = vsel %vm205_vm2, %v204_v11, %v199_v17 }
  0xc6   :  { %v159_v15 = vpop.xlane.xlu0 %158  ;;  %v231_v18 = vrot.slane %v167_v14, %v210_v9 }
  0xc7   :  { %v211_v19 = vrot.slane %v159_v15, %v210_v9 }
  0xc8   :  { %v232_v22 = vsel %vm212_vm3, %v231_v18, %v227_v20 }
  0xc9   :  { %v213_v23 = vsel %vm212_vm3, %v211_v19, %v206_v21 }
  0xca   :  { %v234_v24 = vsel %vm233_vm4, %v232_v22, %v213_v23 }
  0xcb   :  { %467 = vmatmul.mubr.msk.f32.vlgmr.msra.gmra.mrb[0].mxu0 %vm235_vm5, %v234_v24 }
 0x19e   :  { %v304_v27 = vpop.f32.mrb[0].mxu0 }
 0x19f   :  { %v305_v28 = vadd.f32 %v447_v26, %v304_v27  ;;  %v468_v29 = vpop.f32.mrb[1].mxu0 }
 0x1a1   :  { %vm308_vm6 = vcmp.ge.f32.partialorder %v305_v28, 0.0  ;;  %v309_v30 = vmul.f32 0.1, %v305_v28 }
 0x1a3   :  { %v310_v31 = vsel %vm308_vm6, %v305_v28, %v309_v30 }
 0x1a4   :  { %472 = vmatmul.mubr.msk.f32.vlgmr.msra.gmra.mrb[0].mxu1 %vm319_vm7, %v310_v31 }
 0x277   :  { %v389_v33 = vpop.f32.mrb[0].mxu1 }
 0x278   :  { %v390_v34 = vadd.f32 %v449_v32, %v389_v33  ;;  %v473_v35 = vpop.f32.mrb[1].mxu1 }
 0x27a   :  { %v393_v36 = vsub.f32 0.0, %v390_v34 }
 0x27c   :  { %v394_v37 = vmul.f32 1.442695, %v393_v36 }
 0x27e   :  { %490 = vpow2.f32 %v394_v37 }
 0x288   :  { %v491_v38 = vpop.eup %490 }
 0x289   :  { %v396_v39 = vadd.f32 1.0, %v491_v38 }
 0x28b   :  { %492 = vrcp.f32 %v396_v39 }
 0x295   :  { %v493_v44 = vpop.eup %492 }
 0x296   :  { %v406_v45 = vrot.slane %v493_v44, %v405_v43 }
 0x298   :  { %v407_v46 = vcombine.high %v406_v45, %v406_v45  ;;  %v414_v47 = vrot.slane %v406_v45, %v405_v43 }
 0x29a   :  { %v421_v48 = vrot.slane %v407_v46, %v405_v43  ;;  %425 = vst.msk [vmem:[#allocation8] sm:$0x1] %vm424_vm8, %v414_v47 }
 0x29c   :  { %426 = vst.msk [vmem:[#allocation8 + $0x1] sm:$0x1] %vm424_vm8, %v421_v48 }
 0x29d   :  { %549 = shalt.err (!%p546_p6)
}
 0x29e   :  { %s550_s13 = scalar_lea.hbm %s678_s6, 32 }
 0x29f   :  { %p551_p7 = scmp.ne.s32.totalorder %s678_s6, %s550_s13  ;;  %p554_p8 = scmp.lt.u32.totalorder %s550_s13, %s678_s6 }
 0x2a1   :  { %p556_p9 = pnand %p554_p8, %p551_p7 }
 0x2a3   :  { %559 = shalt.err (!%p556_p9)
}
 0x2a4   :  { %s575_s18 = smov 1  }
 0x2a5   :  { %438 = dma.vmem_to_hbm [thread:$0]  %s433_s4, 32, %s678_s6, [#allocation5], %s568_s8, %s568_s8, %s575_s18  }
 0x2a6   :  { %564 = dma.done.wait [#allocation5], 32  }
 0x2a7   :  { %565 = vsyncadd [#allocation5], 4294967264 }
 0x2a8   :  { %442 = vsyncpa [#allocation4], 1 }
 0x2a9   :  { %443 = vsyncpa [#allocation7], 1 }
 0x2aa   :  { %444 = vsyncpa [#allocation5], 1 }

</bundles_post_ra>
